<compile_context>
chip_gen: v5e
topology: v5e:2x2
jax: 0.10.0
libtpu: 0.0.40
codegen_flags: <defaults>
</compile_context>

<pallas_src>
import jax
import jax.numpy as jnp
from jax.experimental import pallas as pl
from jax.experimental.pallas import tpu as pltpu

LANES = 128
SUBLANES = 8
DEFAULT_BLOCK_ROWS = 1024      # rows of the (rows, 128) slab per tile
DEFAULT_NUM_CHUNKS = 2         # leading "parallel" grid axis (v7x: 2 TCs)


# --------------------------------------------------------------------------
# kernels
# --------------------------------------------------------------------------
def _make_bce_kernel(block_rows, steps_per_chunk, full_rows, rem,
                     compute_probs, use_col_mask, need_tail):
    """Weighted BCE-with-logits (+ optional sigmoid) over lane-dense tiles."""

    def kernel(*refs):
        n_in = 4 if use_col_mask else 3
        x_ref, y_ref, pw_ref = refs[0], refs[1], refs[2]
        cmask_ref = refs[3] if use_col_mask else None
        rest = refs[n_in:]
        if compute_probs:
            probs_ref, part_ref, acc_ref = rest
        else:
            part_ref, acc_ref = rest

        c = pl.program_id(0)          # chunk index ("parallel" -> megacore)
        s = pl.program_id(1)          # step within chunk ("arbitrary")

        @pl.when(s == 0)
        def _():
            acc_ref[...] = jnp.zeros_like(acc_ref)

        x = x_ref[...].astype(jnp.float32)      # (block_rows, 128)
        y = y_ref[...].astype(jnp.float32)      # widened once, in-kernel
        pw = pw_ref[...].astype(jnp.float32)    # (1, 128) lane-periodic row

        # Shared EUP transcendental for both the loss and the sigmoid.
        e = jnp.exp(-jnp.abs(x))
        softplus_negabs = jnp.log1p(e) + jnp.maximum(-x, 0.0)

        if compute_probs:
            # Exact divide; pl.reciprocal(approx=True) would only drop VPU
            # refinement ops and costs ~1e-3 probs accuracy -- keep exact.
            inv = 1.0 / (1.0 + e)
            probs_ref[...] = jnp.where(x >= 0.0, inv, e * inv).astype(probs_ref.dtype)

        # PyTorch stable BCE-with-logits with pos_weight:
        #   l_w  = 1 + (pos_weight - 1) * y
        #   loss = (1 - y) * x + l_w * (log1p(exp(-|x|)) + relu(-x))
        log_weight = 1.0 + (pw - 1.0) * y
        per = (1.0 - y) * x + log_weight * softplus_negabs
        if use_col_mask:
            per = per * cmask_ref[...]          # zero padded task columns

        def accumulate(vals):
            # (block_rows,128) -> (block_rows/8, 8, 128): vreg-aligned regroup
            # then pure VPU adds into a single-vreg accumulator (no XLU, no
            # full-tile accumulator traffic).
            acc_ref[...] += vals.reshape(
                block_rows // SUBLANES, SUBLANES, LANES).sum(axis=0)

        if need_tail:
            bidx = c * steps_per_chunk + s               # unclamped block idx
            is_clean = (bidx + 1) * block_rows <= full_rows

            @pl.when(is_clean)
            def _():
                accumulate(per)

            @pl.when(jnp.logical_not(is_clean))
            def _():
                # Row/lane-level validity (no flat int32 index -> no overflow);
                # select, not multiply, so garbage/NaN read from the
                # out-of-bounds part of a partial block cannot leak.
                row = jax.lax.broadcasted_iota(jnp.int32, per.shape, 0)
                grow = bidx * block_rows + row
                valid = grow < full_rows
                if rem:
                    lane = jax.lax.broadcasted_iota(jnp.int32, per.shape, 1)
                    valid = jnp.logical_or(
                        valid, jnp.logical_and(grow == full_rows, lane < rem))
                accumulate(jnp.where(valid, per, 0.0))
        else:
            accumulate(per)

        @pl.when(s == steps_per_chunk - 1)
        def _():
            part_ref[0] = acc_ref[...]          # per-chunk partial (8, 128)

    return kernel


def _sigmoid_kernel(x_ref, p_ref):
    x = x_ref[...].astype(jnp.float32)
    e = jnp.exp(-jnp.abs(x))
    inv = 1.0 / (1.0 + e)
    p_ref[...] = jnp.where(x >= 0.0, inv, e * inv).astype(p_ref.dtype)


# --------------------------------------------------------------------------
# layout helpers (wrapper-side; reshape is free, pads only when unavoidable)
# --------------------------------------------------------------------------
def _ceil_div(a, b):
    return -(-a // b)


def _lane_period(n_tasks):
    """Smallest power of two >= n_tasks that divides 128."""
    p = 1
    while p < n_tasks:
        p *= 2
    if p > LANES:
        # TODO(synk): task counts > 128 need a per-row pos_weight layout.
        raise NotImplementedError("num_tasks > 128 not supported by this kernel")
    return p


def _to_slab(a, n_pad, rows):
    """(B, N) -> (rows, 128) lane-dense slab; pads only if strictly needed."""
    b, n = a.shape
    if n_pad != n:                               # awkward task count only
        a = jnp.pad(a, ((0, 0), (0, n_pad - n)))
    flat = a.reshape(-1)                         # row-major, metadata-only
    if flat.shape[0] != rows * LANES:            # only if B*n_pad % 128 != 0
        flat = jnp.pad(flat, (0, rows * LANES - flat.shape[0]))
    return flat.reshape(rows, LANES)


def _from_slab(slab, b, n, n_pad):
    flat = slab.reshape(-1)
    if flat.shape[0] != b * n_pad:
        flat = flat[: b * n_pad]
    out = flat.reshape(b, n_pad)
    return out[:, :n] if n_pad != n else out


def _block_rows_for(rows, max_tile_rows):
    br = DEFAULT_BLOCK_ROWS if max_tile_rows is None else max_tile_rows
    br = max(SUBLANES, (br // SUBLANES) * SUBLANES)
    return min(br, _ceil_div(rows, SUBLANES) * SUBLANES)


# --------------------------------------------------------------------------
# pallas_call wrappers
# --------------------------------------------------------------------------
def _bce_with_logits_pallas(logits, labels, pos_weights, return_probs,
                            max_tile_rows=None, num_chunks=None):
    assert logits.ndim == 2 and labels.shape == logits.shape
    B, N = logits.shape
    n_pad = _lane_period(N)

    flat_limit = B * n_pad
    rows = _ceil_div(flat_limit, LANES)
    block_rows = _block_rows_for(rows, max_tile_rows)
    n_blocks = _ceil_div(rows, block_rows)

    n_chunks = DEFAULT_NUM_CHUNKS if num_chunks is None else num_chunks
    n_chunks = max(1, min(n_chunks, n_blocks))
    steps = _ceil_div(n_blocks, n_chunks)
    overhang = n_chunks * steps - n_blocks       # 0 or < n_chunks, last chunk

    full_rows = flat_limit // LANES              # fully-valid slab rows
    rem = flat_limit % LANES                     # valid lanes in row full_rows
    need_tail = (rem != 0) or (n_chunks * steps * block_rows != full_rows)

    x2d = _to_slab(logits, n_pad, rows)
    y2d = _to_slab(labels, n_pad, rows)          # native dtype

    pw = (jnp.asarray(pos_weights, jnp.float32) if pos_weights is not None
          else jnp.ones((N,), jnp.float32))
    if n_pad != N:
        pw = jnp.pad(pw, (0, n_pad - N), constant_values=1.0)
    pw_row = jnp.tile(pw, LANES // n_pad).reshape(1, LANES)

    use_col_mask = n_pad != N
    compute_probs = bool(return_probs)

    last_block = n_blocks - 1
    if overhang:
        # Overhang grid points (last chunk only) re-read the last block; their
        # loss contribution is masked to zero and the probs rewrite is a no-op.
        def data_map(c, s):
            return (jnp.minimum(c * steps + s, last_block), 0)
    else:
        def data_map(c, s):
            return (c * steps + s, 0)

    inputs = [x2d, y2d, pw_row]
    in_specs = [
        pl.BlockSpec((block_rows, LANES), data_map),
        pl.BlockSpec((block_rows, LANES), data_map),
        pl.BlockSpec((1, LANES), lambda c, s: (0, 0)),
    ]
    if use_col_mask:
        cmask_row = jnp.tile(
            jnp.concatenate([jnp.ones((N,), jnp.float32),
                             jnp.zeros((n_pad - N,), jnp.float32)]),
            LANES // n_pad).reshape(1, LANES)
        inputs.append(cmask_row)
        in_specs.append(pl.BlockSpec((1, LANES), lambda c, s: (0, 0)))

    out_shapes, out_specs = [], []
    if compute_probs:
        out_shapes.append(jax.ShapeDtypeStruct((rows, LANES), logits.dtype))
        out_specs.append(pl.BlockSpec((block_rows, LANES), data_map))
    # Per-chunk partial losses (one vreg each); wrapper sums them.
    out_shapes.append(jax.ShapeDtypeStruct((n_chunks, SUBLANES, LANES), jnp.float32))
    out_specs.append(pl.BlockSpec((1, SUBLANES, LANES), lambda c, s: (c, 0, 0)))

    kernel = _make_bce_kernel(
        block_rows=block_rows, steps_per_chunk=steps,
        full_rows=full_rows, rem=rem,
        compute_probs=compute_probs, use_col_mask=use_col_mask,
        need_tail=need_tail)

    elems = B * N
    x_item = jnp.dtype(logits.dtype).itemsize
    y_item = jnp.dtype(labels.dtype).itemsize
    bytes_accessed = elems * (x_item + y_item) + 4 * LANES
    if compute_probs:
        bytes_accessed += elems * x_item
    bytes_accessed += n_chunks * SUBLANES * LANES * 4
    cost = pl.CostEstimate(
        flops=8 * elems,
        transcendentals=(3 if compute_probs else 2) * elems,
        bytes_accessed=int(bytes_accessed))

    outs = pl.pallas_call(
        kernel,
        out_shape=tuple(out_shapes),
        grid=(n_chunks, steps),
        in_specs=in_specs,
        out_specs=tuple(out_specs),
        scratch_shapes=[pltpu.VMEM((SUBLANES, LANES), jnp.float32)],
        compiler_params=pltpu.CompilerParams(
            dimension_semantics=("parallel", "arbitrary"),
            vmem_limit_bytes=32 * 1024 * 1024),
        cost_estimate=cost,
    )(*inputs)

    if compute_probs:
        probs_slab, partials = outs
        probs = _from_slab(probs_slab, B, N, n_pad)
    else:
        (partials,) = outs
        probs = None
    loss = jnp.sum(partials) * (1.0 / float(B * N))
    return probs, loss


def _sigmoid_pallas(logits, max_tile_rows=None):
    B, N = logits.shape
    n_pad = _lane_period(N)
    flat_limit = B * n_pad
    rows = _ceil_div(flat_limit, LANES)
    block_rows = _block_rows_for(rows, max_tile_rows)
    n_blocks = _ceil_div(rows, block_rows)
    x2d = _to_slab(logits, n_pad, rows)

    probs_slab = pl.pallas_call(
        _sigmoid_kernel,
        out_shape=jax.ShapeDtypeStruct((rows, LANES), logits.dtype),
        grid=(n_blocks,),
        in_specs=[pl.BlockSpec((block_rows, LANES), lambda i: (i, 0))],
        out_specs=pl.BlockSpec((block_rows, LANES), lambda i: (i, 0)),
        compiler_params=pltpu.CompilerParams(
            dimension_semantics=("parallel",),
            vmem_limit_bytes=32 * 1024 * 1024),
        cost_estimate=pl.CostEstimate(
            flops=4 * B * N, transcendentals=2 * B * N,
            bytes_accessed=2 * B * N * jnp.dtype(logits.dtype).itemsize),
    )(x2d)
    return _from_slab(probs_slab, B, N, n_pad)


# --------------------------------------------------------------------------
# module-level wrapper mirroring the PyTorch forward
# --------------------------------------------------------------------------
class MultiTaskBinaryClassifierLoss:
    def __init__(self, tasks, pos_weights=None):
        self.tasks = list(tasks)
        self.num_logits = len(self.tasks)
        if pos_weights is not None:
            self.pos_weights = jnp.asarray(
                [pos_weights[t] for t in self.tasks], jnp.float32)
        else:
            self.pos_weights = None

    def stacked_to_dict(self, stacked):
        return {task: stacked[:, i] for i, task in enumerate(self.tasks)}

    def __call__(self, logits, labels=None, return_probs=True,
                 max_tile_rows=None, num_chunks=None):
        if labels is not None:
            if isinstance(labels, dict):
                labels = jnp.stack([labels[t] for t in self.tasks], axis=-1)
            probs, loss = _bce_with_logits_pallas(
                logits, labels, self.pos_weights, return_probs,
                max_tile_rows, num_chunks)
            predictions = probs if return_probs else logits
            return predictions, labels, loss
        return _sigmoid_pallas(logits, max_tile_rows) if return_probs else logits


# --------------------------------------------------------------------------
# reference + tests
# --------------------------------------------------------------------------
def _reference(logits, labels, pos_weights):
    x = logits.astype(jnp.float32)
    y = labels.astype(jnp.float32)
    pw = (jnp.asarray(pos_weights, jnp.float32) if pos_weights is not None
          else jnp.ones((x.shape[-1],), jnp.float32)).reshape(1, -1)
    lw = 1.0 + (pw - 1.0) * y
    per = (1.0 - y) * x + lw * (jnp.log1p(jnp.exp(-jnp.abs(x))) + jnp.maximum(-x, 0.0))
    return jax.nn.sigmoid(x), jnp.mean(per)


if __name__ == "__main__":
    key = jax.random.PRNGKey(0)

    # 1) canonical small case: B=8, 4 tasks, dict labels, return_probs=True
    tasks = ["task_a", "task_b", "task_c", "task_d"]
    module = MultiTaskBinaryClassifierLoss(
        tasks, {"task_a": 1.0, "task_b": 2.0, "task_c": 0.5, "task_d": 3.0})
    B = 8
    k1, k2, key = jax.random.split(key, 3)
    logits = jax.random.normal(k1, (B, len(tasks)), jnp.float32)
    labels = jax.random.bernoulli(k2, 0.5, (B, len(tasks))).astype(jnp.float32)
    labels_dict = {t: labels[:, i] for i, t in enumerate(tasks)}

    preds, labels_out, loss = module(logits, labels_dict, return_probs=True)
    jax.block_until_ready((preds, labels_out, loss))
    ref_p, ref_l = _reference(logits, labels, module.pos_weights)
    assert preds.shape == logits.shape
    assert jnp.allclose(preds, ref_p, atol=1e-5, rtol=1e-5)
    assert jnp.allclose(labels_out, labels)
    assert jnp.allclose(loss, ref_l, atol=1e-5, rtol=1e-5)

    # 2) return_probs=False -> loss-only kernel, predictions = logits
    preds2, _, loss2 = module(logits, labels, return_probs=False)
    jax.block_until_ready(loss2)
    assert jnp.allclose(preds2, logits)
    assert jnp.allclose(loss2, ref_l, atol=1e-5, rtol=1e-5)

    # 3) task count that does not divide 128 (column-padding / mask path)
    module3 = MultiTaskBinaryClassifierLoss(["a", "b", "c"],
                                            {"a": 2.0, "b": 0.5, "c": 1.5})
    k1, k2, key = jax.random.split(key, 3)
    logits3 = jax.random.normal(k1, (12, 3), jnp.float32)
    labels3 = jax.random.bernoulli(k2, 0.3, (12, 3)).astype(jnp.float32)
    p3, _, l3 = module3(logits3, labels3, return_probs=True)
    jax.block_until_ready(l3)
    ref_p3, ref_l3 = _reference(logits3, labels3, module3.pos_weights)
    assert jnp.allclose(p3, ref_p3, atol=1e-5, rtol=1e-5)
    assert jnp.allclose(l3, ref_l3, atol=1e-5, rtol=1e-5)

    # 4) multi-tile 2-D grid (2 chunks x 1 step) + partial rows + tail mask
    k1, k2, key = jax.random.split(key, 3)
    logits4 = jax.random.normal(k1, (300, 4), jnp.float32)
    labels4 = jax.random.bernoulli(k2, 0.5, (300, 4)).astype(jnp.float32)
    p4, _, l4 = module(logits4, labels4, return_probs=True, max_tile_rows=8)
    jax.block_until_ready(l4)
    ref_p4, ref_l4 = _reference(logits4, labels4, module.pos_weights)
    assert jnp.allclose(p4, ref_p4, atol=1e-5, rtol=1e-5)
    assert jnp.allclose(l4, ref_l4, atol=1e-5, rtol=1e-5)

    # 5) odd block count -> clamped index maps / overhang masking
    k1, k2, key = jax.random.split(key, 3)
    logits5 = jax.random.normal(k1, (700, 4), jnp.float32)
    labels5 = jax.random.bernoulli(k2, 0.4, (700, 4)).astype(jnp.float32)
    p5, _, l5 = module(logits5, labels5, return_probs=True, max_tile_rows=8)
    jax.block_until_ready(l5)
    ref_p5, ref_l5 = _reference(logits5, labels5, module.pos_weights)
    assert jnp.allclose(p5, ref_p5, atol=1e-5, rtol=1e-5)
    assert jnp.allclose(l5, ref_l5, atol=1e-5, rtol=1e-5)

    # 6) clean path: no padding, no tail, even 2-way split
    k1, k2, key = jax.random.split(key, 3)
    logits6 = jax.random.normal(k1, (1024, 4), jnp.float32)
    labels6 = jax.random.bernoulli(k2, 0.5, (1024, 4)).astype(jnp.float32)
    p6, _, l6 = module(logits6, labels6, return_probs=True, max_tile_rows=8)
    jax.block_until_ready(l6)
    ref_p6, ref_l6 = _reference(logits6, labels6, module.pos_weights)
    assert jnp.allclose(p6, ref_p6, atol=1e-5, rtol=1e-5)
    assert jnp.allclose(l6, ref_l6, atol=1e-5, rtol=1e-5)

    # 7) labels=None path (sigmoid-only kernel)
    p7 = module(logits, labels=None, return_probs=True)
    jax.block_until_ready(p7)
    assert jnp.allclose(p7, jax.nn.sigmoid(logits), atol=1e-5, rtol=1e-5)

    print("KERNEL_OK")
</pallas_src>

<mosaic_0001>
module attributes {stable_mosaic.version = 11 : i64} {
  func.func @kernel(%arg0: i32, %arg1: i32, %arg2: memref<8x128xf32, #tpu.memory_space<vmem>>, %arg3: memref<8x128xf32, #tpu.memory_space<vmem>>, %arg4: memref<1x128xf32, #tpu.memory_space<vmem>>, %arg5: memref<8x128xf32, #tpu.memory_space<vmem>>, %arg6: memref<1x8x128xf32, #tpu.memory_space<vmem>>, %arg7: memref<8x128xf32, #tpu.memory_space<vmem>>) attributes {dimension_semantics = [#tpu.dimension_semantics<parallel>, #tpu.dimension_semantics<arbitrary>], iteration_bounds = array<i64: 1, 1>, scalar_prefetch = 0 : i64, scratch_operands = 1 : i64, tpu.core_type = #tpu.core_type<tc>, window_params = [{transform_indices = @transform_0, window_bounds = array<i64: 8, 128>}, {transform_indices = @transform_1, window_bounds = array<i64: 8, 128>}, {pipeline_mode = #tpu.pipeline_mode<synchronous>, transform_indices = @transform_2, window_bounds = array<i64: 1, 128>}, {transform_indices = @transform_3, window_bounds = array<i64: 8, 128>}, {transform_indices = @transform_4, window_bounds = array<i64: 1, 8, 128>}]} {
    %c0_i32 = arith.constant 0 : i32
    %0 = arith.cmpi eq, %arg1, %c0_i32 : i32
    %1 = arith.extui %0 : i1 to i32
    %c0_i32_0 = arith.constant 0 : i32
    %2 = arith.cmpi ne, %1, %c0_i32_0 : i32
    scf.if %2 {
      %cst_22 = arith.constant 0.000000e+00 : f32
      %49 = vector.broadcast %cst_22 : f32 to vector<8x128xf32>
      %c0_23 = arith.constant 0 : index
      %c0_24 = arith.constant 0 : index
      %50 = vector.load %arg7[%c0_23, %c0_24] : memref<8x128xf32, #tpu.memory_space<vmem>>, vector<8x128xf32>
      tpu.vector_store %arg7[%c0_23, %c0_24], %49 {strides = array<i32>} : memref<8x128xf32, #tpu.memory_space<vmem>>, vector<8x128xf32>,
    } else {
    }
    %c0 = arith.constant 0 : index
    %c0_1 = arith.constant 0 : index
    %3 = vector.load %arg2[%c0, %c0_1] : memref<8x128xf32, #tpu.memory_space<vmem>>, vector<8x128xf32>
    %c0_2 = arith.constant 0 : index
    %c0_3 = arith.constant 0 : index
    %4 = vector.load %arg3[%c0_2, %c0_3] : memref<8x128xf32, #tpu.memory_space<vmem>>, vector<8x128xf32>
    %c0_4 = arith.constant 0 : index
    %c0_5 = arith.constant 0 : index
    %5 = vector.load %arg4[%c0_4, %c0_5] : memref<1x128xf32, #tpu.memory_space<vmem>>, vector<1x128xf32>
    %6 = math.absf %3 : vector<8x128xf32>
    %cst = arith.constant 0.000000e+00 : f32
    %7 = vector.broadcast %cst : f32 to vector<8x128xf32>
    %8 = arith.subf %7, %6 : vector<8x128xf32>
    %9 = math.exp %8 : vector<8x128xf32>
    %10 = math.log1p %9 : vector<8x128xf32>
    %cst_6 = arith.constant 0.000000e+00 : f32
    %11 = vector.broadcast %cst_6 : f32 to vector<8x128xf32>
    %12 = arith.subf %11, %3 : vector<8x128xf32>
    %cst_7 = arith.constant 0.000000e+00 : f32
    %13 = vector.broadcast %cst_7 : f32 to vector<8x128xf32>
    %14 = arith.maximumf %12, %13 : vector<8x128xf32>
    %15 = arith.addf %10, %14 : vector<8x128xf32>
    %cst_8 = arith.constant 1.000000e+00 : f32
    %16 = vector.broadcast %cst_8 : f32 to vector<8x128xf32>
    %17 = arith.addf %16, %9 : vector<8x128xf32>
    %cst_9 = arith.constant 1.000000e+00 : f32
    %18 = vector.broadcast %cst_9 : f32 to vector<8x128xf32>
    %19 = arith.divf %18, %17 : vector<8x128xf32>
    %cst_10 = arith.constant 0.000000e+00 : f32
    %20 = vector.broadcast %cst_10 : f32 to vector<8x128xf32>
    %21 = arith.cmpf oge, %3, %20 : vector<8x128xf32>
    %22 = arith.mulf %9, %19 : vector<8x128xf32>
    %23 = arith.select %21, %19, %22 : vector<8x128xi1>, vector<8x128xf32>
    %c0_11 = arith.constant 0 : index
    %c0_12 = arith.constant 0 : index
    %24 = vector.load %arg5[%c0_11, %c0_12] : memref<8x128xf32, #tpu.memory_space<vmem>>, vector<8x128xf32>
    tpu.vector_store %arg5[%c0_11, %c0_12], %23 {strides = array<i32>} : memref<8x128xf32, #tpu.memory_space<vmem>>, vector<8x128xf32>,
    %cst_13 = arith.constant 1.000000e+00 : f32
    %25 = vector.broadcast %cst_13 : f32 to vector<1x128xf32>
    %26 = arith.subf %5, %25 : vector<1x128xf32>
    %27 = vector.broadcast %26 : vector<1x128xf32> to vector<8x128xf32>
    %28 = arith.mulf %27, %4 : vector<8x128xf32>
    %cst_14 = arith.constant 1.000000e+00 : f32
    %29 = vector.broadcast %cst_14 : f32 to vector<8x128xf32>
    %30 = arith.addf %29, %28 : vector<8x128xf32>
    %cst_15 = arith.constant 1.000000e+00 : f32
    %31 = vector.broadcast %cst_15 : f32 to vector<8x128xf32>
    %32 = arith.subf %31, %4 : vector<8x128xf32>
    %33 = arith.mulf %32, %3 : vector<8x128xf32>
    %34 = arith.mulf %30, %15 : vector<8x128xf32>
    %35 = arith.addf %33, %34 : vector<8x128xf32>
    %c1_i32 = arith.constant 1 : i32
    %36 = arith.muli %arg0, %c1_i32 : i32
    %37 = arith.addi %36, %arg1 : i32
    %c1_i32_16 = arith.constant 1 : i32
    %38 = arith.addi %37, %c1_i32_16 : i32
    %c8_i32 = arith.constant 8 : i32
    %39 = arith.muli %38, %c8_i32 : i32
    %c0_i32_17 = arith.constant 0 : i32
    %40 = arith.cmpi sle, %39, %c0_i32_17 : i32
    %41 = arith.extui %40 : i1 to i32
    %c0_i32_18 = arith.constant 0 : i32
    %42 = arith.cmpi ne, %41, %c0_i32_18 : i32
    scf.if %42 {
      %c0_22 = arith.constant 0 : index
      %c0_23 = arith.constant 0 : index
      %49 = vector.load %arg7[%c0_22, %c0_23] : memref<8x128xf32, #tpu.memory_space<vmem>>, vector<8x128xf32>
      %50 = vector.shape_cast %35 : vector<8x128xf32> to vector<1x8x128xf32>
      %cst_24 = arith.constant dense<0.000000e+00> : vector<8x128xf32>
      %51 = vector.multi_reduction <add>, %50, %cst_24 [0] : vector<1x8x128xf32> to vector<8x128xf32>
      %52 = arith.addf %49, %51 : vector<8x128xf32>
      %c0_25 = arith.constant 0 : index
      %c0_26 = arith.constant 0 : index
      %53 = vector.load %arg7[%c0_25, %c0_26] : memref<8x128xf32, #tpu.memory_space<vmem>>, vector<8x128xf32>
      tpu.vector_store %arg7[%c0_25, %c0_26], %52 {strides = array<i32>} : memref<8x128xf32, #tpu.memory_space<vmem>>, vector<8x128xf32>,
    } else {
    }
    %true = arith.constant true
    %43 = arith.xori %40, %true : i1
    %44 = arith.extui %43 : i1 to i32
    %c0_i32_19 = arith.constant 0 : i32
    %45 = arith.cmpi ne, %44, %c0_i32_19 : i32
    scf.if %45 {
      %49 = tpu.iota {dimensions = array<i32: 0>} : vector<8x128xi32>
      %c8_i32_22 = arith.constant 8 : i32
      %50 = arith.muli %37, %c8_i32_22 : i32
      %51 = vector.broadcast %50 : i32 to vector<8x128xi32>
      %52 = arith.addi %51, %49 : vector<8x128xi32>
      %c0_i32_23 = arith.constant 0 : i32
      %53 = vector.broadcast %c0_i32_23 : i32 to vector<8x128xi32>
      %54 = arith.cmpi slt, %52, %53 : vector<8x128xi32>
      %55 = tpu.iota {dimensions = array<i32: 1>} : vector<8x128xi32>
      %c0_i32_24 = arith.constant 0 : i32
      %56 = vector.broadcast %c0_i32_24 : i32 to vector<8x128xi32>
      %57 = arith.cmpi eq, %52, %56 : vector<8x128xi32>
      %c32_i32 = arith.constant 32 : i32
      %58 = vector.broadcast %c32_i32 : i32 to vector<8x128xi32>
      %59 = arith.cmpi slt, %55, %58 : vector<8x128xi32>
      %60 = arith.andi %57, %59 : vector<8x128xi1>
      %61 = arith.ori %54, %60 : vector<8x128xi1>
      %cst_25 = arith.constant 0.000000e+00 : f32
      %62 = vector.broadcast %cst_25 : f32 to vector<8x128xf32>
      %63 = arith.select %61, %35, %62 : vector<8x128xi1>, vector<8x128xf32>
      %c0_26 = arith.constant 0 : index
      %c0_27 = arith.constant 0 : index
      %64 = vector.load %arg7[%c0_26, %c0_27] : memref<8x128xf32, #tpu.memory_space<vmem>>, vector<8x128xf32>
      %65 = vector.shape_cast %63 : vector<8x128xf32> to vector<1x8x128xf32>
      %cst_28 = arith.constant dense<0.000000e+00> : vector<8x128xf32>
      %66 = vector.multi_reduction <add>, %65, %cst_28 [0] : vector<1x8x128xf32> to vector<8x128xf32>
      %67 = arith.addf %64, %66 : vector<8x128xf32>
      %c0_29 = arith.constant 0 : index
      %c0_30 = arith.constant 0 : index
      %68 = vector.load %arg7[%c0_29, %c0_30] : memref<8x128xf32, #tpu.memory_space<vmem>>, vector<8x128xf32>
      tpu.vector_store %arg7[%c0_29, %c0_30], %67 {strides = array<i32>} : memref<8x128xf32, #tpu.memory_space<vmem>>, vector<8x128xf32>,
    } else {
    }
    %c0_i32_20 = arith.constant 0 : i32
    %46 = arith.cmpi eq, %arg1, %c0_i32_20 : i32
    %47 = arith.extui %46 : i1 to i32
    %c0_i32_21 = arith.constant 0 : i32
    %48 = arith.cmpi ne, %47, %c0_i32_21 : i32
    scf.if %48 {
      %c0_22 = arith.constant 0 : index
      %c0_23 = arith.constant 0 : index
      %49 = vector.load %arg7[%c0_22, %c0_23] : memref<8x128xf32, #tpu.memory_space<vmem>>, vector<8x128xf32>
      %c0_24 = arith.constant 0 : index
      %c0_25 = arith.constant 0 : index
      %c0_26 = arith.constant 0 : index
      %50 = vector.load %arg6[%c0_24, %c0_25, %c0_26] : memref<1x8x128xf32, #tpu.memory_space<vmem>>, vector<1x8x128xf32>
      %51 = vector.shape_cast %50 : vector<1x8x128xf32> to vector<8x128xf32>
      %52 = vector.shape_cast %49 : vector<8x128xf32> to vector<1x8x128xf32>
      tpu.vector_store %arg6[%c0_24, %c0_25, %c0_26], %52 {strides = array<i32>} : memref<1x8x128xf32, #tpu.memory_space<vmem>>, vector<1x8x128xf32>,
    } else {
    }
    return
  }
  func.func @transform_0(%arg0: i32, %arg1: i32) -> (i32, i32) {
    %c1_i32 = arith.constant 1 : i32
    %0 = arith.muli %arg0, %c1_i32 : i32
    %1 = arith.addi %0, %arg1 : i32
    %c0_i32 = arith.constant 0 : i32
    %c0_i32_0 = arith.constant 0 : i32
    return %1, %c0_i32 : i32, i32
  }
  func.func @transform_1(%arg0: i32, %arg1: i32) -> (i32, i32) {
    %c1_i32 = arith.constant 1 : i32
    %0 = arith.muli %arg0, %c1_i32 : i32
    %1 = arith.addi %0, %arg1 : i32
    %c0_i32 = arith.constant 0 : i32
    %c0_i32_0 = arith.constant 0 : i32
    return %1, %c0_i32 : i32, i32
  }
  func.func @transform_2(%arg0: i32, %arg1: i32) -> (i32, i32) {
    %c0_i32 = arith.constant 0 : i32
    %c0_i32_0 = arith.constant 0 : i32
    %c0_i32_1 = arith.constant 0 : i32
    return %c0_i32, %c0_i32_0 : i32, i32
  }
  func.func @transform_3(%arg0: i32, %arg1: i32) -> (i32, i32) {
    %c1_i32 = arith.constant 1 : i32
    %0 = arith.muli %arg0, %c1_i32 : i32
    %1 = arith.addi %0, %arg1 : i32
    %c0_i32 = arith.constant 0 : i32
    %c0_i32_0 = arith.constant 0 : i32
    return %1, %c0_i32 : i32, i32
  }
  func.func @transform_4(%arg0: i32, %arg1: i32) -> (i32, i32, i32) {
    %c0_i32 = arith.constant 0 : i32
    %c0_i32_0 = arith.constant 0 : i32
    %c0_i32_1 = arith.constant 0 : i32
    return %arg0, %c0_i32, %c0_i32_0 : i32, i32, i32
  }
}

</mosaic_0001>

<bundles_post_ra>
// kernel: tpu_custom_call.1
= control target key start
LH: loop header
LB: loop body
LE: loop exit
PB: predicated region body
PF: predicated region fallthrough
CT: control target
= control target key end

     0   :  { %10 = vsyncpa [#allocation4], 0  ;;  %s376_s0 = inlined_call_operand.hbm [shape: f32[1,128], index: 0, kind: input, shape index: {}]   ;;  %s377_s1 = inlined_call_operand.hbm [shape: f32[1,128], index: 1, kind: input, shape index: {}]   ;;  %s378_s2 = inlined_call_operand.vmem [shape: f32[1,128], index: 2, kind: input, shape index: {}]   ;;  %s379_s3 = inlined_call_operand.hbm [shape: f32[1,128], index: 3, kind: output, shape index: {0}]   ;;  %s380_s4 = inlined_call_operand.hbm [shape: f32[1,8,128], index: 4, kind: output, shape index: {1}]  }
   0x1   :  { %11 = vsyncpa [#allocation7], 0 }
   0x2   :  { %12 = vsyncpa [#allocation5], 0 }
   0x3   :  { %13 = vsyncpa [#allocation10], 0 }
   0x4   :  { %21 = vsyncadd [#allocation4], 112  ;;  %s24_s17 = sshll.u32 %s376_s0, 4  ;;  %s321_s18 = smov [#allocation3]   ;;  %s25_s17 = int_to_ptr.hbm [resolvable:$true] %s24_s17 }
   0x5   :  { %s26_s19 = sshll.u32 %s321_s18, 4  ;;  %s322_s20 = smov 16   ;;  %s27_s19 = int_to_ptr.vmem [resolvable:$true] %s26_s19 }
   0x6   :  { %s323_s21 = smov 1  }
   0x7   :  { %32 = dma.hbm_to_vmem [thread:$0]  %s25_s17, 16, %s27_s19, [#allocation4], %s322_s20, %s322_s20, %s323_s21  }
   0x8   :  { %40 = vsyncadd [#allocation7], 112  ;;  %s43_s24 = sshll.u32 %s377_s1, 4  ;;  %s324_s25 = smov [#allocation6]   ;;  %s44_s24 = int_to_ptr.hbm [resolvable:$true] %s43_s24 }
   0x9   :  { %s45_s26 = sshll.u32 %s324_s25, 4  ;;  %s46_s26 = int_to_ptr.vmem [resolvable:$true] %s45_s26 }
   0xa   :  { %51 = dma.hbm_to_vmem [thread:$0]  %s44_s24, 16, %s46_s26, [#allocation7], %s322_s20, %s322_s20, %s323_s21  }
   0xb   :  { %313 = dma.done.wait [#allocation4], 128  }
   0xc   :  { %314 = vsyncadd [#allocation4], 4294967168 }
   0xd   :  { %315 = dma.done.wait [#allocation7], 128  }
   0xe   :  { %316 = vsyncadd [#allocation7], 4294967168  ;;  %v76_v0 = vld [vmem:[#allocation3] sm:$0xff]  ;;  %v77_v10 = vld [vmem:[#allocation6] sm:$0xff]  ;;  %v140_v12 = vlaneseq }
   0xf   :  { %v79_v1 = vand.u32 2147483647, %v76_v0  ;;  %v78_v4 = vld [vmem:[%s378_s2] sm:$0x1]  ;;  %v92_v14 = vsub.f32 0.0, %v76_v0  ;;  %v121_v23 = vsub.f32 1.0, %v77_v10 }
  0x10   :  { %v204_v5 = vadd.f32 -1.0, %v78_v4  ;;  %v141_v18 = vshrl.u32 %v140_v12, 7  ;;  %v147_v19 = vand.u32 127, %v140_v12  ;;  %vm111_vm8 = vcmp.ge.f32.partialorder %v76_v0, 0.0 }
  0x11   :  { %v80_v2 = vsub.f32 0.0, %v79_v1  ;;  %v93_v22 = vmax.f32 %v92_v14, 0.0  ;;  %v122_v32 = vmul.f32 %v121_v23, %v76_v0 }
  0x12   :  { %v117_v9 = vperm.slane %v204_v5, 0  ;;  %vm148_vm3 = vcmp.eq.s32.totalorder %v141_v18, 0  ;;  %vm149_vm4 = vcmp.lt.s32.totalorder %v147_v19, 32 }
  0x13   :  { %v81_v3 = vmul.f32 1.442695, %v80_v2  ;;  %vm150_vm7 = vmand %vm148_vm3, %vm149_vm4 }
  0x14   :  { %v119_v15 = vmul.f32 %v117_v9, %v77_v10 }
  0x15   :  { %211 = vpow2.f32 %v81_v3 }
  0x16   :  { %v120_v26 = vadd.f32 1.0, %v119_v15 }
  0x1b   :  { %v212_v6 = vpop.eup %211 }
  0x1c   :  { %v83_v7 = vadd.f32 1.0, %v212_v6  ;;  %v86_v8 = vmul.f32 -0.5, %v212_v6  ;;  %v89_v13 = vand.u32 2147483647, %v212_v6 }
  0x1e   :  { %213 = vrcp.f32 %v83_v7  ;;  %v87_v11 = vadd.f32 1.0, %v86_v8  ;;  %vm90_vm0 = vcmp.lt.f32.partialorder %v89_v13, 0.0004427343  ;;  %v107_v24 = vand.u32 2147483648, %v83_v7 }
  0x1f   :  { %215 = vlog2.f32 %v83_v7  ;;  %vm101_vm1 = vweird.f32 %v83_v7  ;;  %v105_v28 = vand.u32 2147483647, %v83_v7 }
  0x20   :  { %v88_v17 = vmul.f32 %v212_v6, %v87_v11  ;;  %v108_v33 = vor.u32 1.1754944e-38, %v107_v24 }
  0x21   :  { %vm106_vm6 = vcmp.eq.f32.partialorder %v105_v28, 8.507059e+37 }
  0x24   :  { %v214_v16 = vpop.eup %213 }
  0x25   :  { %v216_v20 = vpop.eup %215  ;;  %v97_v21 = vmul.f32 %v214_v16, %v83_v7  ;;  %vm102_vm2 = vweird.f32 %v214_v16 }
  0x26   :  { %v85_v25 = vmul.f32 0.6931472, %v216_v20  ;;  %vm103_vm5 = vmor %vm101_vm1, %vm102_vm2 }
  0x27   :  { %v98_v27 = vsub.f32 1.0, %v97_v21 }
  0x28   :  { %v91_v29 = vsel %vm90_vm0, %v88_v17, %v85_v25 }
  0x29   :  { %v99_v30 = vmul.f32 %v214_v16, %v98_v27  ;;  %v94_v31 = vadd.f32 %v93_v22, %v91_v29 }
  0x2b   :  { %v100_v34 = vadd.f32 %v214_v16, %v99_v30  ;;  %v123_v35 = vmul.f32 %v120_v26, %v94_v31 }
  0x2d   :  { %v104_v36 = vsel %vm103_vm5, %v214_v16, %v100_v34  ;;  %v124_v37 = vadd.f32 %v123_v35, %v122_v32 }
  0x2e   :  { %v109_v38 = vsel %vm106_vm6, %v108_v33, %v104_v36 }
  0x2f   :  { %v112_v39 = vmul.f32 %v212_v6, %v109_v38  ;;  %v152_v40 = vsel %vm150_vm7, %v124_v37, 0.0 }
  0x30   :  { %161 = vst [vmem:[#allocation9] sm:$0xff] %v152_v40 }
  0x31   :  { %v113_v41 = vsel %vm111_vm8, %v109_v38, %v112_v39 }
  0x32   :  { %114 = vst [vmem:[#allocation8] sm:$0xff] %v113_v41 }
  0x33   :  { %169 = vsyncadd [#allocation5], 112  ;;  %s174_s28 = sshll.u32 %s379_s3, 4  ;;  %s325_s29 = smov [#allocation8]   ;;  %s175_s28 = int_to_ptr.hbm [resolvable:$true] %s174_s28 }
  0x34   :  { %s172_s30 = sshll.u32 %s325_s29, 4  ;;  %s326_s5 = smov [#allocation9]   ;;  %s173_s30 = int_to_ptr.vmem [resolvable:$true] %s172_s30 }
  0x35   :  { %180 = dma.vmem_to_hbm [thread:$0]  %s173_s30, 16, %s175_s28, [#allocation5], %s322_s20, %s322_s20, %s323_s21  }
  0x36   :  { %s186_s6 = sshll.u32 %s326_s5, 4  ;;  %s188_s9 = sshll.u32 %s380_s4, 4  ;;  %s187_s6 = int_to_ptr.vmem [resolvable:$true] %s186_s6  ;;  %s189_s9 = int_to_ptr.hbm [resolvable:$true] %s188_s9 }
  0x37   :  { %191 = dma.vmem_to_hbm [thread:$0]  %s187_s6, 128, %s189_s9, [#allocation10]  }
  0x38   :  { %317 = dma.done.wait [#allocation5], 128  }
  0x39   :  { %318 = vsyncadd [#allocation5], 4294967168 }
  0x3a   :  { %319 = dma.done.wait [#allocation10], 128  }
  0x3b   :  { %320 = vsyncadd [#allocation10], 4294967168 }
  0x3c   :  { %200 = vsyncpa [#allocation4], 1 }
  0x3d   :  { %201 = vsyncpa [#allocation7], 1 }
  0x3e   :  { %202 = vsyncpa [#allocation5], 1 }
  0x3f   :  { %203 = vsyncpa [#allocation10], 1 }

</bundles_post_ra>
